<compile_context>
chip_gen: v5e
topology: v5e:2x2
jax: 0.10.0
libtpu: 0.0.40
codegen_flags: <defaults>
</compile_context>

<pallas_src>
import functools

import jax
import jax.numpy as jnp
from jax.experimental import pallas as pl
from jax.experimental.pallas import tpu as pltpu

INPUT_LEN = 12 + 3   # 15
HIDDEN = 15
OUT = 10
DEFAULT_TB = 512     # batch rows per grid step (multiple of 8)


def _round_up(n, m):
    return ((n + m - 1) // m) * m


def mlp_kernel(x_ref, w1_ref, w2_ref, o_ref):
    # x_ref:  (TB, INPUT_LEN) f32
    # w1_ref: (INPUT_LEN, HIDDEN) f32   (pre-transposed from PyTorch layout)
    # w2_ref: (HIDDEN, OUT) f32
    # o_ref:  (TB, OUT) f32
    h = jnp.maximum(
        jnp.dot(x_ref[...], w1_ref[...], preferred_element_type=jnp.float32),
        0.0,
    )
    o_ref[...] = jnp.dot(h, w2_ref[...], preferred_element_type=jnp.float32)


def prepare_params(w1_pt, w2_pt):
    """One-time (model-load) conversion from PyTorch (out,in) to matmul (in,out)."""
    return jnp.transpose(w1_pt), jnp.transpose(w2_pt)


@functools.partial(jax.jit, static_argnames=("tb",))
def default_net_forward(x, w1, w2, *, tb=DEFAULT_TB):
    """
    x:  (B, INPUT_LEN) f32
    w1: (INPUT_LEN, HIDDEN) f32  -- from prepare_params
    w2: (HIDDEN, OUT) f32        -- from prepare_params
    returns (B, OUT) f32
    """
    B = x.shape[0]
    # Batch tile: multiple of 8 (sublane rule), clamped so it never exceeds the
    # (padded) batch; lane dims (15 / 10) equal the full array dims, which the
    # Mosaic (8,128) rule allows.
    tb_eff = min(tb, _round_up(B, 8))
    Bp = _round_up(B, tb_eff)
    if Bp != B:
        x = jnp.pad(x, ((0, Bp - B), (0, 0)))  # zero rows -> zero outputs, sliced off

    grid = (Bp // tb_eff,)
    out = pl.pallas_call(
        mlp_kernel,
        out_shape=jax.ShapeDtypeStruct((Bp, OUT), jnp.float32),
        grid=grid,
        in_specs=[
            pl.BlockSpec((tb_eff, INPUT_LEN), lambda i: (i, 0)),
            pl.BlockSpec((INPUT_LEN, HIDDEN), lambda i: (0, 0)),
            pl.BlockSpec((HIDDEN, OUT), lambda i: (0, 0)),
        ],
        out_specs=pl.BlockSpec((tb_eff, OUT), lambda i: (i, 0)),
        compiler_params=pltpu.CompilerParams(
            dimension_semantics=("parallel",),
        ),
        cost_estimate=pl.CostEstimate(
            flops=2 * Bp * (INPUT_LEN * HIDDEN + HIDDEN * OUT),
            transcendentals=0,
            bytes_accessed=4 * (Bp * INPUT_LEN + Bp * OUT
                                + INPUT_LEN * HIDDEN + HIDDEN * OUT),
        ),
    )(x, w1, w2)
    return out[:B] if Bp != B else out


def reference_forward(x, w1_pt, w2_pt):
    return jnp.maximum(x @ w1_pt.T, 0.0) @ w2_pt.T


if __name__ == "__main__":
    key = jax.random.PRNGKey(0)
    k_x1, k_x2, k_w1, k_w2 = jax.random.split(key, 4)

    # PyTorch nn.Linear weight layouts: (out_features, in_features).
    w1_pt = jax.random.uniform(
        k_w1, (HIDDEN, INPUT_LEN), dtype=jnp.float32, minval=-0.25, maxval=0.25)
    w2_pt = jax.random.uniform(
        k_w2, (OUT, HIDDEN), dtype=jnp.float32, minval=-0.25, maxval=0.25)

    # Hoisted out of the per-call path ("model-load" time).
    w1, w2 = prepare_params(w1_pt, w2_pt)

    # Case 1: batch large enough to exercise the batch grid (grid = (2,) at TB=512).
    B1 = 1024
    x1 = jax.random.normal(k_x1, (B1, INPUT_LEN), dtype=jnp.float32)
    out1 = jax.block_until_ready(default_net_forward(x1, w1, w2))
    ref1 = reference_forward(x1, w1_pt, w2_pt)
    assert out1.shape == (B1, OUT), out1.shape
    assert jnp.allclose(out1, ref1, atol=1e-5, rtol=1e-5), "mismatch (large batch)"

    # Case 2: tiny ragged batch (exercises padding + clamped tile).
    B2 = 20
    x2 = jax.random.normal(k_x2, (B2, INPUT_LEN), dtype=jnp.float32)
    out2 = jax.block_until_ready(default_net_forward(x2, w1, w2))
    ref2 = reference_forward(x2, w1_pt, w2_pt)
    assert out2.shape == (B2, OUT), out2.shape
    assert jnp.allclose(out2, ref2, atol=1e-5, rtol=1e-5), "mismatch (small batch)"

    print("KERNEL_OK")
</pallas_src>

<mosaic_0001>
module attributes {stable_mosaic.version = 11 : i64} {
  func.func @mlp_kernel(%arg0: i32, %arg1: memref<512x15xf32, #tpu.memory_space<vmem>>, %arg2: memref<15x15xf32, #tpu.memory_space<vmem>>, %arg3: memref<15x10xf32, #tpu.memory_space<vmem>>, %arg4: memref<512x10xf32, #tpu.memory_space<vmem>>) attributes {dimension_semantics = [#tpu.dimension_semantics<parallel>], iteration_bounds = array<i64: 2>, scalar_prefetch = 0 : i64, scratch_operands = 0 : i64, tpu.core_type = #tpu.core_type<tc>, window_params = [{transform_indices = @transform_0, window_bounds = array<i64: 512, 15>}, {pipeline_mode = #tpu.pipeline_mode<synchronous>, transform_indices = @transform_1, window_bounds = array<i64: 15, 15>}, {pipeline_mode = #tpu.pipeline_mode<synchronous>, transform_indices = @transform_2, window_bounds = array<i64: 15, 10>}, {transform_indices = @transform_3, window_bounds = array<i64: 512, 10>}]} {
    %c0 = arith.constant 0 : index
    %c0_0 = arith.constant 0 : index
    %0 = vector.load %arg1[%c0, %c0_0] : memref<512x15xf32, #tpu.memory_space<vmem>>, vector<512x15xf32>
    %c0_1 = arith.constant 0 : index
    %c0_2 = arith.constant 0 : index
    %1 = vector.load %arg2[%c0_1, %c0_2] : memref<15x15xf32, #tpu.memory_space<vmem>>, vector<15x15xf32>
    %cst = arith.constant dense<0.000000e+00> : vector<512x15xf32>
    %2 = tpu.matmul %0, %1, %cst {dimension_numbers = #tpu.dot_dimension_numbers<[1], [0], [0], [1], [0, 0, 1, 1], [], []>} : vector<512x15xf32>, vector<15x15xf32>, vector<512x15xf32> -> vector<512x15xf32>
    %cst_3 = arith.constant 0.000000e+00 : f32
    %3 = vector.broadcast %cst_3 : f32 to vector<512x15xf32>
    %4 = arith.maximumf %2, %3 : vector<512x15xf32>
    %c0_4 = arith.constant 0 : index
    %c0_5 = arith.constant 0 : index
    %5 = vector.load %arg3[%c0_4, %c0_5] : memref<15x10xf32, #tpu.memory_space<vmem>>, vector<15x10xf32>
    %cst_6 = arith.constant dense<0.000000e+00> : vector<512x10xf32>
    %6 = tpu.matmul %4, %5, %cst_6 {dimension_numbers = #tpu.dot_dimension_numbers<[1], [0], [0], [1], [0, 0, 1, 1], [], []>} : vector<512x15xf32>, vector<15x10xf32>, vector<512x10xf32> -> vector<512x10xf32>
    %c0_7 = arith.constant 0 : index
    %c0_8 = arith.constant 0 : index
    %7 = vector.load %arg4[%c0_7, %c0_8] : memref<512x10xf32, #tpu.memory_space<vmem>>, vector<512x10xf32>
    tpu.vector_store %arg4[%c0_7, %c0_8], %6 {strides = array<i32>} : memref<512x10xf32, #tpu.memory_space<vmem>>, vector<512x10xf32>,
    return
  }
  func.func @transform_0(%arg0: i32) -> (i32, i32) {
    %c0_i32 = arith.constant 0 : i32
    %c0_i32_0 = arith.constant 0 : i32
    return %arg0, %c0_i32 : i32, i32
  }
  func.func @transform_1(%arg0: i32) -> (i32, i32) {
    %c0_i32 = arith.constant 0 : i32
    %c0_i32_0 = arith.constant 0 : i32
    %c0_i32_1 = arith.constant 0 : i32
    return %c0_i32, %c0_i32_0 : i32, i32
  }
  func.func @transform_2(%arg0: i32) -> (i32, i32) {
    %c0_i32 = arith.constant 0 : i32
    %c0_i32_0 = arith.constant 0 : i32
    %c0_i32_1 = arith.constant 0 : i32
    return %c0_i32, %c0_i32_0 : i32, i32
  }
  func.func @transform_3(%arg0: i32) -> (i32, i32) {
    %c0_i32 = arith.constant 0 : i32
    %c0_i32_0 = arith.constant 0 : i32
    return %arg0, %c0_i32 : i32, i32
  }
}

</mosaic_0001>

<bundles_post_ra>
// kernel: default_net_forward.1
= control target key start
LH: loop header
LB: loop body
LE: loop exit
PB: predicated region body
PF: predicated region fallthrough
CT: control target
= control target key end

     0   :  { %s1418_s12 = smov 0   ;;  %s1782_s0 = inlined_call_operand.vmem [shape: f32[1024,15], index: 0, kind: input, shape index: {}]   ;;  %s1783_s1 = inlined_call_operand.vmem [shape: f32[15,15], index: 1, kind: input, shape index: {}]   ;;  %s1784_s2 = inlined_call_operand.vmem [shape: f32[15,10], index: 2, kind: input, shape index: {}]   ;;  %s1785_s3 = inlined_call_operand.vmem [shape: f32[1024,10], index: 3, kind: output, shape index: {}]  }
   0x1 LB: > { %s1237_s13 = sadd.s32 4294967295, %s1396_s12   ;;  %p1241_p0 = scmp.ge.s32.totalorder %s1396_s12, 1  ;;  %s1396_s12 = sphi %s1418_s12, %s13_s12  }
   0x2   : > { %p138_p1 = scmp.lt.s32.totalorder %s1396_s12, 3 }
   0x4   : > { %p139_p2 = pnand %p1241_p0, %p138_p1 }
   0x5   : > { %s1242_s18 = sshll.u32 (!%p139_p2), %s1237_s13, 6 }
   0x6   : > { %142 = sbr.rel (%p139_p2) target bundleno = 530 (0x212), region = 32  ;;  %p163_p3 = scmp.lt.s32.totalorder (!%p139_p2), %s1242_s18, 127 }
   0xb   : > { %v239_v0 = vld [vmem:[%s1783_s1 + $0x8] sm:$0x7f]  ;;  %vm433_vm0 = vcmask 1046528   ;;  %v238_v1 = vld [vmem:[%s1783_s1] sm:$0xff]  ;;  %s1787_s18 = smov (!%p163_p3, %s1242_s18), 127  ;;  %vm240_vm1 = vcmask 121856  }
   0xc   : > { %1378 = vmatpush.msk.msra.mxu2 %vm433_vm0, %v239_v0  ;;  %1246 = vmatpush.msk.msra.mxu0 %vm433_vm0, %v239_v0  ;;  %s1243_s19 = sshll.u32 %s1787_s18, 3  ;;  %v711_v28 = vld [vmem:[%s1784_s2 + $0x8] sm:$0x7f]  ;;  %v710_v29 = vld [vmem:[%s1784_s2] sm:$0xff]  ;;  %vm1116_vm2 = vcmask 80896  }
   0xd   : > { %s1442_s22 = scalar_lea.vmem %s1782_s0, %s1243_s19  ;;  %1380 = vmatpush.msk.msra.mxu3 %vm433_vm0, %v711_v28  ;;  %1311 = vmatpush.msk.msra.mxu1 %vm433_vm0, %v711_v28  ;;  %s1616_s29 = scalar_lea.vmem %s1785_s3, %s1243_s19 }
   0xe   : > { %1379 = vmatpush.msra.mxu2 %v238_v1  ;;  %452 = vmatpush.msra.mxu0 %v238_v1  ;;  %v206_v2 = vld [vmem:[%s1442_s22 + $0x100] sm:$0xff]  ;;  %v207_v4 = vld [vmem:[%s1442_s22 + $0x108] sm:$0xff]  ;;  %v208_v6 = vld [vmem:[%s1442_s22 + $0x110] sm:$0xff] }
   0xf   : > { %v174_v3 = vld [vmem:[%s1442_s22] sm:$0xff]  ;;  %1279 = vmatmul.msk.f32.vlgmr.msra.gmra.mxu2 %vm240_vm1, %v206_v2  ;;  %v175_v5 = vld [vmem:[%s1442_s22 + $0x8] sm:$0xff]  ;;  %v176_v7 = vld [vmem:[%s1442_s22 + $0x10] sm:$0xff]  ;;  %1381 = vmatpush.msra.mxu3 %v710_v29 }
  0x10   : > { %1247 = vmatmul.msk.f32.vlgmr.msra.gmra.mxu0 %vm240_vm1, %v174_v3  ;;  %v209_v8 = vld [vmem:[%s1442_s22 + $0x118] sm:$0xff]  ;;  %v210_v10 = vld [vmem:[%s1442_s22 + $0x120] sm:$0xff]  ;;  %v211_v12 = vld [vmem:[%s1442_s22 + $0x128] sm:$0xff]  ;;  %922 = vmatpush.msra.mxu1 %v710_v29 }
  0x11   : > { %v177_v9 = vld [vmem:[%s1442_s22 + $0x18] sm:$0xff]  ;;  %v178_v11 = vld [vmem:[%s1442_s22 + $0x20] sm:$0xff]  ;;  %v179_v13 = vld [vmem:[%s1442_s22 + $0x28] sm:$0xff] }
  0x12   : > { %v212_v14 = vld [vmem:[%s1442_s22 + $0x130] sm:$0xff]  ;;  %v213_v16 = vld [vmem:[%s1442_s22 + $0x138] sm:$0xff]  ;;  %v214_v18 = vld [vmem:[%s1442_s22 + $0x140] sm:$0xff] }
  0x13   : > { %v180_v15 = vld [vmem:[%s1442_s22 + $0x30] sm:$0xff]  ;;  %v181_v17 = vld [vmem:[%s1442_s22 + $0x38] sm:$0xff]  ;;  %v182_v19 = vld [vmem:[%s1442_s22 + $0x40] sm:$0xff] }
  0x14   : > { %v215_v20 = vld [vmem:[%s1442_s22 + $0x148] sm:$0xff]  ;;  %v216_v22 = vld [vmem:[%s1442_s22 + $0x150] sm:$0xff]  ;;  %v217_v24 = vld [vmem:[%s1442_s22 + $0x158] sm:$0xff] }
  0x15   : > { %v183_v21 = vld [vmem:[%s1442_s22 + $0x48] sm:$0xff]  ;;  %v184_v23 = vld [vmem:[%s1442_s22 + $0x50] sm:$0xff]  ;;  %v185_v25 = vld [vmem:[%s1442_s22 + $0x58] sm:$0xff] }
  0x16   : > { %v218_v26 = vld [vmem:[%s1442_s22 + $0x160] sm:$0xff]  ;;  %v219_v30 = vld [vmem:[%s1442_s22 + $0x168] sm:$0xff]  ;;  %v220_v32 = vld [vmem:[%s1442_s22 + $0x170] sm:$0xff] }
  0x17   : > { %1280 = vmatmul.msk.f32.gmra.mxu2 %vm240_vm1, %v207_v4  ;;  %v186_v27 = vld [vmem:[%s1442_s22 + $0x60] sm:$0xff]  ;;  %v187_v31 = vld [vmem:[%s1442_s22 + $0x68] sm:$0xff]  ;;  %v188_v33 = vld [vmem:[%s1442_s22 + $0x70] sm:$0xff] }
  0x18   : > { %1248 = vmatmul.msk.f32.gmra.mxu0 %vm240_vm1, %v175_v5  ;;  %v221_v34 = vld [vmem:[%s1442_s22 + $0x178] sm:$0xff]  ;;  %v222_v36 = vld [vmem:[%s1442_s22 + $0x180] sm:$0xff]  ;;  %v223_v42 = vld [vmem:[%s1442_s22 + $0x188] sm:$0xff] }
  0x19   : > { %v189_v35 = vld [vmem:[%s1442_s22 + $0x78] sm:$0xff]  ;;  %v190_v38 = vld [vmem:[%s1442_s22 + $0x80] sm:$0xff]  ;;  %v191_v44 = vld [vmem:[%s1442_s22 + $0x88] sm:$0xff] }
  0x1a   : > { %v224_v48 = vld [vmem:[%s1442_s22 + $0x190] sm:$0xff]  ;;  %v225_v54 = vld [vmem:[%s1442_s22 + $0x198] sm:$0xff]  ;;  %v226_v60 = vld [vmem:[%s1442_s22 + $0x1a0] sm:$0xff] }
  0x1b   : > { %v192_v50 = vld [vmem:[%s1442_s22 + $0x90] sm:$0xff]  ;;  %v193_v56 = vld [vmem:[%s1442_s22 + $0x98] sm:$0xff]  ;;  %v194_v62 = vld [vmem:[%s1442_s22 + $0xa0] sm:$0xff] }
  0x1c   : > { %v227_v2 = vld [vmem:[%s1442_s22 + $0x1a8] sm:$0xff] }
  0x1d   : > { %v195_v4 = vld [vmem:[%s1442_s22 + $0xa8] sm:$0xff] }
  0x1e   : > { %v199_v28 = vld [vmem:[%s1442_s22 + $0xc8] sm:$0xff] }
  0x1f   : > { %1281 = vmatmul.msk.f32.gmra.mxu2 %vm240_vm1, %v208_v6 }
  0x20   : > { %1249 = vmatmul.msk.f32.gmra.mxu0 %vm240_vm1, %v176_v7 }
  0x27   : > { %1282 = vmatmul.msk.f32.gmra.mxu2 %vm240_vm1, %v209_v8  ;;  %v228_v8 = vld [vmem:[%s1442_s22 + $0x1b0] sm:$0xff] }
  0x28   : > { %1250 = vmatmul.msk.f32.gmra.mxu0 %vm240_vm1, %v177_v9 }
  0x2f   : > { %1283 = vmatmul.msk.f32.gmra.mxu2 %vm240_vm1, %v210_v10  ;;  %v196_v10 = vld [vmem:[%s1442_s22 + $0xb0] sm:$0xff] }
  0x30   : > { %1251 = vmatmul.msk.f32.gmra.mxu0 %vm240_vm1, %v178_v11 }
  0x37   : > { %1284 = vmatmul.msk.f32.gmra.mxu2 %vm240_vm1, %v211_v12 }
  0x38   : > { %1252 = vmatmul.msk.f32.gmra.mxu0 %vm240_vm1, %v179_v13 }
  0x3f   : > { %1285 = vmatmul.msk.f32.gmra.mxu2 %vm240_vm1, %v212_v14  ;;  %v229_v14 = vld [vmem:[%s1442_s22 + $0x1b8] sm:$0xff] }
  0x40   : > { %1253 = vmatmul.msk.f32.gmra.mxu0 %vm240_vm1, %v180_v15 }
  0x47   : > { %1286 = vmatmul.msk.f32.gmra.mxu2 %vm240_vm1, %v213_v16  ;;  %v197_v16 = vld [vmem:[%s1442_s22 + $0xb8] sm:$0xff] }
  0x48   : > { %1254 = vmatmul.msk.f32.gmra.mxu0 %vm240_vm1, %v181_v17 }
  0x4f   : > { %1287 = vmatmul.msk.f32.gmra.mxu2 %vm240_vm1, %v214_v18 }
  0x50   : > { %1255 = vmatmul.msk.f32.gmra.mxu0 %vm240_vm1, %v182_v19 }
  0x57   : > { %1288 = vmatmul.msk.f32.gmra.mxu2 %vm240_vm1, %v215_v20  ;;  %v230_v20 = vld [vmem:[%s1442_s22 + $0x1c0] sm:$0xff] }
  0x58   : > { %1256 = vmatmul.msk.f32.gmra.mxu0 %vm240_vm1, %v183_v21 }
  0x5f   : > { %1289 = vmatmul.msk.f32.gmra.mxu2 %vm240_vm1, %v216_v22  ;;  %v198_v22 = vld [vmem:[%s1442_s22 + $0xc0] sm:$0xff] }
  0x60   : > { %1257 = vmatmul.msk.f32.gmra.mxu0 %vm240_vm1, %v184_v23 }
  0x67   : > { %1290 = vmatmul.msk.f32.gmra.mxu2 %vm240_vm1, %v217_v24 }
  0x68   : > { %1258 = vmatmul.msk.f32.gmra.mxu0 %vm240_vm1, %v185_v25 }
  0x6f   : > { %1291 = vmatmul.msk.f32.gmra.mxu2 %vm240_vm1, %v218_v26  ;;  %v231_v26 = vld [vmem:[%s1442_s22 + $0x1c8] sm:$0xff] }
  0x70   : > { %1259 = vmatmul.msk.f32.gmra.mxu0 %vm240_vm1, %v186_v27 }
  0x77   : > { %1292 = vmatmul.msk.f32.gmra.mxu2 %vm240_vm1, %v219_v30 }
  0x78   : > { %1260 = vmatmul.msk.f32.gmra.mxu0 %vm240_vm1, %v187_v31 }
  0x7f   : > { %1293 = vmatmul.msk.f32.gmra.mxu2 %vm240_vm1, %v220_v32  ;;  %v232_v32 = vld [vmem:[%s1442_s22 + $0x1d0] sm:$0xff] }
  0x80   : > { %1261 = vmatmul.msk.f32.gmra.mxu0 %vm240_vm1, %v188_v33 }
  0x87   : > { %1294 = vmatmul.msk.f32.gmra.mxu2 %vm240_vm1, %v221_v34  ;;  %v200_v34 = vld [vmem:[%s1442_s22 + $0xd0] sm:$0xff] }
  0x88   : > { %1262 = vmatmul.msk.f32.gmra.mxu0 %vm240_vm1, %v189_v35 }
  0x8d   : > { %v454_v37 = vpop.f32.mrf.mxu0 }
  0x8e   : > { %v646_v39 = vmax.f32 %v454_v37, 0.0 }
  0x8f   : > { %1295 = vmatmul.msk.f32.gmra.mxu2 %vm240_vm1, %v222_v36 }
  0x90   : > { %1263 = vmatmul.msk.f32.gmra.mxu0 %vm240_vm1, %v190_v38  ;;  %1312 = vmatmul.msk.f32.vlgmr.msra.gmra.mxu1 %vm240_vm1, %v646_v39  ;;  %v233_v38 = vld [vmem:[%s1442_s22 + $0x1d8] sm:$0xff] }
  0x92   : > { %v550_v40 = vpop.f32.mrf.mxu2 }
  0x93   : > { %v678_v41 = vmax.f32 %v550_v40, 0.0  ;;  %v201_v40 = vld [vmem:[%s1442_s22 + $0xd8] sm:$0xff] }
  0x95   : > { %v457_v43 = vpop.f32.mrf.mxu0  ;;  %1344 = vmatmul.msk.f32.vlgmr.msra.gmra.mxu3 %vm240_vm1, %v678_v41 }
  0x96   : > { %v647_v45 = vmax.f32 %v457_v43, 0.0 }
  0x97   : > { %1296 = vmatmul.msk.f32.gmra.mxu2 %vm240_vm1, %v223_v42 }
  0x98   : > { %1264 = vmatmul.msk.f32.gmra.mxu0 %vm240_vm1, %v191_v44  ;;  %1313 = vmatmul.msk.f32.gmra.mxu1 %vm240_vm1, %v647_v45  ;;  %v234_v44 = vld [vmem:[%s1442_s22 + $0x1e0] sm:$0xff] }
  0x9a   : > { %v553_v46 = vpop.f32.mrf.mxu2 }
  0x9b   : > { %v679_v47 = vmax.f32 %v553_v46, 0.0  ;;  %v202_v46 = vld [vmem:[%s1442_s22 + $0xe0] sm:$0xff] }
  0x9d   : > { %v460_v49 = vpop.f32.mrf.mxu0  ;;  %1345 = vmatmul.msk.f32.gmra.mxu3 %vm240_vm1, %v679_v47 }
  0x9e   : > { %v648_v51 = vmax.f32 %v460_v49, 0.0 }
  0x9f   : > { %1297 = vmatmul.msk.f32.gmra.mxu2 %vm240_vm1, %v224_v48 }
  0xa0   : > { %1265 = vmatmul.msk.f32.gmra.mxu0 %vm240_vm1, %v192_v50  ;;  %1314 = vmatmul.msk.f32.gmra.mxu1 %vm240_vm1, %v648_v51  ;;  %v235_v50 = vld [vmem:[%s1442_s22 + $0x1e8] sm:$0xff] }
  0xa2   : > { %v556_v52 = vpop.f32.mrf.mxu2 }
  0xa3   : > { %v680_v53 = vmax.f32 %v556_v52, 0.0  ;;  %v203_v52 = vld [vmem:[%s1442_s22 + $0xe8] sm:$0xff] }
  0xa5   : > { %v463_v55 = vpop.f32.mrf.mxu0  ;;  %1346 = vmatmul.msk.f32.gmra.mxu3 %vm240_vm1, %v680_v53 }
  0xa6   : > { %v649_v57 = vmax.f32 %v463_v55, 0.0 }
  0xa7   : > { %1298 = vmatmul.msk.f32.gmra.mxu2 %vm240_vm1, %v225_v54 }
  0xa8   : > { %1266 = vmatmul.msk.f32.gmra.mxu0 %vm240_vm1, %v193_v56  ;;  %1315 = vmatmul.msk.f32.gmra.mxu1 %vm240_vm1, %v649_v57  ;;  %v236_v56 = vld [vmem:[%s1442_s22 + $0x1f0] sm:$0xff] }
  0xaa   : > { %v559_v58 = vpop.f32.mrf.mxu2 }
  0xab   : > { %v681_v59 = vmax.f32 %v559_v58, 0.0  ;;  %v204_v58 = vld [vmem:[%s1442_s22 + $0xf0] sm:$0xff] }
  0xad   : > { %v466_v61 = vpop.f32.mrf.mxu0  ;;  %1347 = vmatmul.msk.f32.gmra.mxu3 %vm240_vm1, %v681_v59 }
  0xae   : > { %v650_v63 = vmax.f32 %v466_v61, 0.0 }
  0xaf   : > { %1299 = vmatmul.msk.f32.gmra.mxu2 %vm240_vm1, %v226_v60 }
  0xb0   : > { %1267 = vmatmul.msk.f32.gmra.mxu0 %vm240_vm1, %v194_v62  ;;  %1316 = vmatmul.msk.f32.gmra.mxu1 %vm240_vm1, %v650_v63  ;;  %v237_v62 = vld [vmem:[%s1442_s22 + $0x1f8] sm:$0xff] }
  0xb2   : > { %v562_v0 = vpop.f32.mrf.mxu2 }
  0xb3   : > { %v682_v1 = vmax.f32 %v562_v0, 0.0  ;;  %v205_v0 = vld [vmem:[%s1442_s22 + $0xf8] sm:$0xff] }
  0xb5   : > { %v469_v3 = vpop.f32.mrf.mxu0  ;;  %1348 = vmatmul.msk.f32.gmra.mxu3 %vm240_vm1, %v682_v1 }
  0xb6   : > { %v651_v5 = vmax.f32 %v469_v3, 0.0 }
  0xb7   : > { %1300 = vmatmul.msk.f32.gmra.mxu2 %vm240_vm1, %v227_v2 }
  0xb8   : > { %1268 = vmatmul.msk.f32.gmra.mxu0 %vm240_vm1, %v195_v4  ;;  %1317 = vmatmul.msk.f32.gmra.mxu1 %vm240_vm1, %v651_v5 }
  0xba   : > { %v565_v6 = vpop.f32.mrf.mxu2 }
  0xbb   : > { %v683_v7 = vmax.f32 %v565_v6, 0.0 }
  0xbd   : > { %v472_v9 = vpop.f32.mrf.mxu0  ;;  %1349 = vmatmul.msk.f32.gmra.mxu3 %vm240_vm1, %v683_v7 }
  0xbe   : > { %v652_v11 = vmax.f32 %v472_v9, 0.0 }
  0xbf   : > { %1301 = vmatmul.msk.f32.gmra.mxu2 %vm240_vm1, %v228_v8 }
  0xc0   : > { %1269 = vmatmul.msk.f32.gmra.mxu0 %vm240_vm1, %v196_v10  ;;  %1318 = vmatmul.msk.f32.gmra.mxu1 %vm240_vm1, %v652_v11 }
  0xc2   : > { %v568_v12 = vpop.f32.mrf.mxu2 }
  0xc3   : > { %v684_v13 = vmax.f32 %v568_v12, 0.0 }
  0xc5   : > { %v475_v15 = vpop.f32.mrf.mxu0  ;;  %1350 = vmatmul.msk.f32.gmra.mxu3 %vm240_vm1, %v684_v13 }
  0xc6   : > { %v653_v17 = vmax.f32 %v475_v15, 0.0 }
  0xc7   : > { %1302 = vmatmul.msk.f32.gmra.mxu2 %vm240_vm1, %v229_v14 }
  0xc8   : > { %1270 = vmatmul.msk.f32.gmra.mxu0 %vm240_vm1, %v197_v16  ;;  %1319 = vmatmul.msk.f32.gmra.mxu1 %vm240_vm1, %v653_v17 }
  0xca   : > { %v571_v18 = vpop.f32.mrf.mxu2 }
  0xcb   : > { %v685_v19 = vmax.f32 %v571_v18, 0.0 }
  0xcd   : > { %v478_v21 = vpop.f32.mrf.mxu0  ;;  %1351 = vmatmul.msk.f32.gmra.mxu3 %vm240_vm1, %v685_v19 }
  0xce   : > { %v654_v23 = vmax.f32 %v478_v21, 0.0 }
  0xcf   : > { %1303 = vmatmul.msk.f32.gmra.mxu2 %vm240_vm1, %v230_v20 }
  0xd0   : > { %1271 = vmatmul.msk.f32.gmra.mxu0 %vm240_vm1, %v198_v22  ;;  %1320 = vmatmul.msk.f32.gmra.mxu1 %vm240_vm1, %v654_v23 }
  0xd2   : > { %v574_v24 = vpop.f32.mrf.mxu2 }
  0xd3   : > { %v686_v25 = vmax.f32 %v574_v24, 0.0 }
  0xd5   : > { %v481_v27 = vpop.f32.mrf.mxu0  ;;  %1352 = vmatmul.msk.f32.gmra.mxu3 %vm240_vm1, %v686_v25 }
  0xd6   : > { %v655_v29 = vmax.f32 %v481_v27, 0.0 }
  0xd7   : > { %1304 = vmatmul.msk.f32.gmra.mxu2 %vm240_vm1, %v231_v26 }
  0xd8   : > { %1272 = vmatmul.msk.f32.gmra.mxu0 %vm240_vm1, %v199_v28  ;;  %1321 = vmatmul.msk.f32.gmra.mxu1 %vm240_vm1, %v655_v29 }
  0xda   : > { %v577_v30 = vpop.f32.mrf.mxu2 }
  0xdb   : > { %v687_v31 = vmax.f32 %v577_v30, 0.0 }
  0xdd   : > { %v484_v33 = vpop.f32.mrf.mxu0  ;;  %1353 = vmatmul.msk.f32.gmra.mxu3 %vm240_vm1, %v687_v31 }
  0xde   : > { %v656_v35 = vmax.f32 %v484_v33, 0.0 }
  0xdf   : > { %1305 = vmatmul.msk.f32.gmra.mxu2 %vm240_vm1, %v232_v32 }
  0xe0   : > { %1273 = vmatmul.msk.f32.gmra.mxu0 %vm240_vm1, %v200_v34  ;;  %1322 = vmatmul.msk.f32.gmra.mxu1 %vm240_vm1, %v656_v35 }
  0xe2   : > { %v580_v36 = vpop.f32.mrf.mxu2 }
  0xe3   : > { %v688_v37 = vmax.f32 %v580_v36, 0.0 }
  0xe5   : > { %v487_v39 = vpop.f32.mrf.mxu0  ;;  %1354 = vmatmul.msk.f32.gmra.mxu3 %vm240_vm1, %v688_v37 }
  0xe6   : > { %v657_v41 = vmax.f32 %v487_v39, 0.0 }
  0xe7   : > { %1306 = vmatmul.msk.f32.gmra.mxu2 %vm240_vm1, %v233_v38 }
  0xe8   : > { %1274 = vmatmul.msk.f32.gmra.mxu0 %vm240_vm1, %v201_v40  ;;  %1323 = vmatmul.msk.f32.gmra.mxu1 %vm240_vm1, %v657_v41 }
  0xea   : > { %v583_v42 = vpop.f32.mrf.mxu2 }
  0xeb   : > { %v689_v43 = vmax.f32 %v583_v42, 0.0 }
  0xed   : > { %v490_v45 = vpop.f32.mrf.mxu0  ;;  %1355 = vmatmul.msk.f32.gmra.mxu3 %vm240_vm1, %v689_v43 }
  0xee   : > { %v658_v47 = vmax.f32 %v490_v45, 0.0 }
  0xef   : > { %1307 = vmatmul.msk.f32.gmra.mxu2 %vm240_vm1, %v234_v44 }
  0xf0   : > { %1275 = vmatmul.msk.f32.gmra.mxu0 %vm240_vm1, %v202_v46  ;;  %1324 = vmatmul.msk.f32.gmra.mxu1 %vm240_vm1, %v658_v47 }
  0xf2   : > { %v586_v48 = vpop.f32.mrf.mxu2 }
  0xf3   : > { %v690_v49 = vmax.f32 %v586_v48, 0.0 }
  0xf5   : > { %v493_v51 = vpop.f32.mrf.mxu0  ;;  %1356 = vmatmul.msk.f32.gmra.mxu3 %vm240_vm1, %v690_v49 }
  0xf6   : > { %v659_v53 = vmax.f32 %v493_v51, 0.0 }
  0xf7   : > { %1308 = vmatmul.msk.f32.gmra.mxu2 %vm240_vm1, %v235_v50 }
  0xf8   : > { %1276 = vmatmul.msk.f32.gmra.mxu0 %vm240_vm1, %v203_v52  ;;  %1325 = vmatmul.msk.f32.gmra.mxu1 %vm240_vm1, %v659_v53 }
  0xfa   : > { %v589_v54 = vpop.f32.mrf.mxu2 }
  0xfb   : > { %v691_v55 = vmax.f32 %v589_v54, 0.0 }
  0xfd   : > { %v496_v57 = vpop.f32.mrf.mxu0  ;;  %1357 = vmatmul.msk.f32.gmra.mxu3 %vm240_vm1, %v691_v55 }
  0xfe   : > { %v660_v59 = vmax.f32 %v496_v57, 0.0 }
  0xff   : > { %1309 = vmatmul.msk.f32.gmra.mxu2 %vm240_vm1, %v236_v56 }
 0x100   : > { %1277 = vmatmul.msk.f32.gmra.mxu0 %vm240_vm1, %v204_v58  ;;  %1326 = vmatmul.msk.f32.gmra.mxu1 %vm240_vm1, %v660_v59 }
 0x102   : > { %v592_v60 = vpop.f32.mrf.mxu2 }
 0x103   : > { %v692_v61 = vmax.f32 %v592_v60, 0.0 }
 0x105   : > { %v499_v63 = vpop.f32.mrf.mxu0  ;;  %1358 = vmatmul.msk.f32.gmra.mxu3 %vm240_vm1, %v692_v61 }
 0x106   : > { %v661_v1 = vmax.f32 %v499_v63, 0.0 }
 0x107   : > { %1310 = vmatmul.msk.f32.gmra.mxu2 %vm240_vm1, %v237_v62 }
 0x108   : > { %1278 = vmatmul.msk.f32.gmra.mxu0 %vm240_vm1, %v205_v0  ;;  %1327 = vmatmul.msk.f32.gmra.mxu1 %vm240_vm1, %v661_v1 }
 0x10a   : > { %v595_v2 = vpop.f32.mrf.mxu2 }
 0x10b   : > { %v693_v3 = vmax.f32 %v595_v2, 0.0 }
 0x10d   : > { %v502_v4 = vpop.f32.mrf.mxu0  ;;  %1359 = vmatmul.msk.f32.gmra.mxu3 %vm240_vm1, %v693_v3  ;;  %v924_v6 = vpop.f32.mrf.mxu1 }
 0x10e   : > { %v662_v5 = vmax.f32 %v502_v4, 0.0  ;;  %1117 = vst.msk [vmem:[%s1616_s29] sm:$0xff] %vm1116_vm2, %v924_v6 }
 0x110   : > { %1328 = vmatmul.msk.f32.gmra.mxu1 %vm240_vm1, %v662_v5 }
 0x112   : > { %v598_v7 = vpop.f32.mrf.mxu2 }
 0x113   : > { %v694_v8 = vmax.f32 %v598_v7, 0.0 }
 0x115   : > { %v505_v9 = vpop.f32.mrf.mxu0  ;;  %1360 = vmatmul.msk.f32.gmra.mxu3 %vm240_vm1, %v694_v8  ;;  %v927_v11 = vpop.f32.mrf.mxu1 }
 0x116   : > { %v663_v10 = vmax.f32 %v505_v9, 0.0  ;;  %1118 = vst.msk [vmem:[%s1616_s29 + $0x8] sm:$0xff] %vm1116_vm2, %v927_v11 }
 0x118   : > { %v1020_v12 = vpop.f32.mrf.mxu3  ;;  %1329 = vmatmul.msk.f32.gmra.mxu1 %vm240_vm1, %v663_v10 }
 0x119   : > { %1149 = vst.msk [vmem:[%s1616_s29 + $0x100] sm:$0xff] %vm1116_vm2, %v1020_v12 }
 0x11a   : > { %v601_v13 = vpop.f32.mrf.mxu2 }
 0x11b   : > { %v695_v14 = vmax.f32 %v601_v13, 0.0 }
 0x11d   : > { %v508_v15 = vpop.f32.mrf.mxu0  ;;  %1361 = vmatmul.msk.f32.gmra.mxu3 %vm240_vm1, %v695_v14  ;;  %v930_v17 = vpop.f32.mrf.mxu1 }
 0x11e   : > { %v664_v16 = vmax.f32 %v508_v15, 0.0  ;;  %1119 = vst.msk [vmem:[%s1616_s29 + $0x10] sm:$0xff] %vm1116_vm2, %v930_v17 }
 0x120   : > { %v1023_v18 = vpop.f32.mrf.mxu3  ;;  %1330 = vmatmul.msk.f32.gmra.mxu1 %vm240_vm1, %v664_v16 }
 0x121   : > { %1150 = vst.msk [vmem:[%s1616_s29 + $0x108] sm:$0xff] %vm1116_vm2, %v1023_v18 }
 0x122   : > { %v604_v19 = vpop.f32.mrf.mxu2 }
 0x123   : > { %v696_v20 = vmax.f32 %v604_v19, 0.0 }
 0x125   : > { %v511_v21 = vpop.f32.mrf.mxu0  ;;  %1362 = vmatmul.msk.f32.gmra.mxu3 %vm240_vm1, %v696_v20  ;;  %v933_v23 = vpop.f32.mrf.mxu1 }
 0x126   : > { %v665_v22 = vmax.f32 %v511_v21, 0.0  ;;  %1120 = vst.msk [vmem:[%s1616_s29 + $0x18] sm:$0xff] %vm1116_vm2, %v933_v23 }
 0x128   : > { %v1026_v24 = vpop.f32.mrf.mxu3  ;;  %1331 = vmatmul.msk.f32.gmra.mxu1 %vm240_vm1, %v665_v22 }
 0x129   : > { %1151 = vst.msk [vmem:[%s1616_s29 + $0x110] sm:$0xff] %vm1116_vm2, %v1026_v24 }
 0x12a   : > { %v607_v25 = vpop.f32.mrf.mxu2 }
 0x12b   : > { %v697_v26 = vmax.f32 %v607_v25, 0.0 }
 0x12d   : > { %v514_v27 = vpop.f32.mrf.mxu0  ;;  %1363 = vmatmul.msk.f32.gmra.mxu3 %vm240_vm1, %v697_v26  ;;  %v936_v29 = vpop.f32.mrf.mxu1 }
 0x12e   : > { %v666_v28 = vmax.f32 %v514_v27, 0.0  ;;  %1121 = vst.msk [vmem:[%s1616_s29 + $0x20] sm:$0xff] %vm1116_vm2, %v936_v29 }
 0x130   : > { %v1029_v30 = vpop.f32.mrf.mxu3  ;;  %1332 = vmatmul.msk.f32.gmra.mxu1 %vm240_vm1, %v666_v28 }
 0x131   : > { %1152 = vst.msk [vmem:[%s1616_s29 + $0x118] sm:$0xff] %vm1116_vm2, %v1029_v30 }
 0x132   : > { %v610_v31 = vpop.f32.mrf.mxu2 }
 0x133   : > { %v698_v32 = vmax.f32 %v610_v31, 0.0 }
 0x135   : > { %v517_v33 = vpop.f32.mrf.mxu0  ;;  %1364 = vmatmul.msk.f32.gmra.mxu3 %vm240_vm1, %v698_v32  ;;  %v939_v35 = vpop.f32.mrf.mxu1 }
 0x136   : > { %v667_v34 = vmax.f32 %v517_v33, 0.0  ;;  %1122 = vst.msk [vmem:[%s1616_s29 + $0x28] sm:$0xff] %vm1116_vm2, %v939_v35 }
 0x138   : > { %v1032_v36 = vpop.f32.mrf.mxu3  ;;  %1333 = vmatmul.msk.f32.gmra.mxu1 %vm240_vm1, %v667_v34 }
 0x139   : > { %1153 = vst.msk [vmem:[%s1616_s29 + $0x120] sm:$0xff] %vm1116_vm2, %v1032_v36 }
 0x13a   : > { %v613_v37 = vpop.f32.mrf.mxu2 }
 0x13b   : > { %v699_v38 = vmax.f32 %v613_v37, 0.0 }
 0x13d   : > { %v520_v39 = vpop.f32.mrf.mxu0  ;;  %1365 = vmatmul.msk.f32.gmra.mxu3 %vm240_vm1, %v699_v38  ;;  %v942_v41 = vpop.f32.mrf.mxu1 }
 0x13e   : > { %v668_v40 = vmax.f32 %v520_v39, 0.0  ;;  %1123 = vst.msk [vmem:[%s1616_s29 + $0x30] sm:$0xff] %vm1116_vm2, %v942_v41 }
 0x140   : > { %v1035_v42 = vpop.f32.mrf.mxu3  ;;  %1334 = vmatmul.msk.f32.gmra.mxu1 %vm240_vm1, %v668_v40 }
 0x141   : > { %1154 = vst.msk [vmem:[%s1616_s29 + $0x128] sm:$0xff] %vm1116_vm2, %v1035_v42 }
 0x142   : > { %v616_v43 = vpop.f32.mrf.mxu2 }
 0x143   : > { %v700_v44 = vmax.f32 %v616_v43, 0.0 }
 0x145   : > { %v523_v45 = vpop.f32.mrf.mxu0  ;;  %1366 = vmatmul.msk.f32.gmra.mxu3 %vm240_vm1, %v700_v44  ;;  %v945_v47 = vpop.f32.mrf.mxu1 }
 0x146   : > { %v669_v46 = vmax.f32 %v523_v45, 0.0  ;;  %1124 = vst.msk [vmem:[%s1616_s29 + $0x38] sm:$0xff] %vm1116_vm2, %v945_v47 }
 0x148   : > { %v1038_v48 = vpop.f32.mrf.mxu3  ;;  %1335 = vmatmul.msk.f32.gmra.mxu1 %vm240_vm1, %v669_v46 }
 0x149   : > { %1155 = vst.msk [vmem:[%s1616_s29 + $0x130] sm:$0xff] %vm1116_vm2, %v1038_v48 }
 0x14a   : > { %v619_v49 = vpop.f32.mrf.mxu2 }
 0x14b   : > { %v701_v50 = vmax.f32 %v619_v49, 0.0 }
 0x14d   : > { %v526_v51 = vpop.f32.mrf.mxu0  ;;  %1367 = vmatmul.msk.f32.gmra.mxu3 %vm240_vm1, %v701_v50  ;;  %v948_v53 = vpop.f32.mrf.mxu1 }
 0x14e   : > { %v670_v52 = vmax.f32 %v526_v51, 0.0  ;;  %1125 = vst.msk [vmem:[%s1616_s29 + $0x40] sm:$0xff] %vm1116_vm2, %v948_v53 }
 0x150   : > { %v1041_v54 = vpop.f32.mrf.mxu3  ;;  %1336 = vmatmul.msk.f32.gmra.mxu1 %vm240_vm1, %v670_v52 }
 0x151   : > { %1156 = vst.msk [vmem:[%s1616_s29 + $0x138] sm:$0xff] %vm1116_vm2, %v1041_v54 }
 0x152   : > { %v622_v55 = vpop.f32.mrf.mxu2 }
 0x153   : > { %v702_v56 = vmax.f32 %v622_v55, 0.0 }
 0x155   : > { %v529_v57 = vpop.f32.mrf.mxu0  ;;  %1368 = vmatmul.msk.f32.gmra.mxu3 %vm240_vm1, %v702_v56  ;;  %v951_v59 = vpop.f32.mrf.mxu1 }
 0x156   : > { %v671_v58 = vmax.f32 %v529_v57, 0.0  ;;  %1126 = vst.msk [vmem:[%s1616_s29 + $0x48] sm:$0xff] %vm1116_vm2, %v951_v59 }
 0x158   : > { %v1044_v60 = vpop.f32.mrf.mxu3  ;;  %1337 = vmatmul.msk.f32.gmra.mxu1 %vm240_vm1, %v671_v58 }
 0x159   : > { %1157 = vst.msk [vmem:[%s1616_s29 + $0x140] sm:$0xff] %vm1116_vm2, %v1044_v60 }
 0x15a   : > { %v625_v61 = vpop.f32.mrf.mxu2 }
 0x15b   : > { %v703_v62 = vmax.f32 %v625_v61, 0.0 }
 0x15d   : > { %v532_v63 = vpop.f32.mrf.mxu0  ;;  %1369 = vmatmul.msk.f32.gmra.mxu3 %vm240_vm1, %v703_v62  ;;  %v954_v1 = vpop.f32.mrf.mxu1 }
 0x15e   : > { %v672_v0 = vmax.f32 %v532_v63, 0.0  ;;  %1127 = vst.msk [vmem:[%s1616_s29 + $0x50] sm:$0xff] %vm1116_vm2, %v954_v1 }
 0x160   : > { %v1047_v2 = vpop.f32.mrf.mxu3  ;;  %1338 = vmatmul.msk.f32.gmra.mxu1 %vm240_vm1, %v672_v0 }
 0x161   : > { %1158 = vst.msk [vmem:[%s1616_s29 + $0x148] sm:$0xff] %vm1116_vm2, %v1047_v2 }
 0x162   : > { %v628_v3 = vpop.f32.mrf.mxu2 }
 0x163   : > { %v704_v4 = vmax.f32 %v628_v3, 0.0 }
 0x165   : > { %v535_v5 = vpop.f32.mrf.mxu0  ;;  %1370 = vmatmul.msk.f32.gmra.mxu3 %vm240_vm1, %v704_v4  ;;  %v957_v7 = vpop.f32.mrf.mxu1 }
 0x166   : > { %v673_v6 = vmax.f32 %v535_v5, 0.0  ;;  %1128 = vst.msk [vmem:[%s1616_s29 + $0x58] sm:$0xff] %vm1116_vm2, %v957_v7 }
 0x168   : > { %v1050_v8 = vpop.f32.mrf.mxu3  ;;  %1339 = vmatmul.msk.f32.gmra.mxu1 %vm240_vm1, %v673_v6 }
 0x169   : > { %1159 = vst.msk [vmem:[%s1616_s29 + $0x150] sm:$0xff] %vm1116_vm2, %v1050_v8 }
 0x16a   : > { %v631_v9 = vpop.f32.mrf.mxu2 }
 0x16b   : > { %v705_v10 = vmax.f32 %v631_v9, 0.0 }
 0x16d   : > { %v538_v11 = vpop.f32.mrf.mxu0  ;;  %1371 = vmatmul.msk.f32.gmra.mxu3 %vm240_vm1, %v705_v10  ;;  %v960_v13 = vpop.f32.mrf.mxu1 }
 0x16e   : > { %v674_v12 = vmax.f32 %v538_v11, 0.0  ;;  %1129 = vst.msk [vmem:[%s1616_s29 + $0x60] sm:$0xff] %vm1116_vm2, %v960_v13 }
 0x170   : > { %v1053_v14 = vpop.f32.mrf.mxu3  ;;  %1340 = vmatmul.msk.f32.gmra.mxu1 %vm240_vm1, %v674_v12 }
 0x171   : > { %1160 = vst.msk [vmem:[%s1616_s29 + $0x158] sm:$0xff] %vm1116_vm2, %v1053_v14 }
 0x172   : > { %v634_v15 = vpop.f32.mrf.mxu2 }
 0x173   : > { %v706_v16 = vmax.f32 %v634_v15, 0.0 }
 0x175   : > { %v541_v17 = vpop.f32.mrf.mxu0  ;;  %1372 = vmatmul.msk.f32.gmra.mxu3 %vm240_vm1, %v706_v16  ;;  %v963_v19 = vpop.f32.mrf.mxu1 }
 0x176   : > { %v675_v18 = vmax.f32 %v541_v17, 0.0  ;;  %1130 = vst.msk [vmem:[%s1616_s29 + $0x68] sm:$0xff] %vm1116_vm2, %v963_v19 }
 0x178   : > { %v1056_v20 = vpop.f32.mrf.mxu3  ;;  %1341 = vmatmul.msk.f32.gmra.mxu1 %vm240_vm1, %v675_v18 }
 0x179   : > { %1161 = vst.msk [vmem:[%s1616_s29 + $0x160] sm:$0xff] %vm1116_vm2, %v1056_v20 }
 0x17a   : > { %v637_v21 = vpop.f32.mrf.mxu2 }
 0x17b   : > { %v707_v22 = vmax.f32 %v637_v21, 0.0 }
 0x17d   : > { %v544_v23 = vpop.f32.mrf.mxu0  ;;  %1373 = vmatmul.msk.f32.gmra.mxu3 %vm240_vm1, %v707_v22  ;;  %v966_v25 = vpop.f32.mrf.mxu1 }
 0x17e   : > { %v676_v24 = vmax.f32 %v544_v23, 0.0  ;;  %1131 = vst.msk [vmem:[%s1616_s29 + $0x70] sm:$0xff] %vm1116_vm2, %v966_v25 }
 0x180   : > { %v1059_v26 = vpop.f32.mrf.mxu3  ;;  %1342 = vmatmul.msk.f32.gmra.mxu1 %vm240_vm1, %v676_v24 }
 0x181   : > { %1162 = vst.msk [vmem:[%s1616_s29 + $0x168] sm:$0xff] %vm1116_vm2, %v1059_v26 }
 0x182   : > { %v640_v27 = vpop.f32.mrf.mxu2 }
 0x183   : > { %v708_v28 = vmax.f32 %v640_v27, 0.0 }
 0x185   : > { %v547_v29 = vpop.f32.mrf.mxu0  ;;  %1374 = vmatmul.msk.f32.gmra.mxu3 %vm240_vm1, %v708_v28  ;;  %v969_v31 = vpop.f32.mrf.mxu1 }
 0x186   : > { %v677_v30 = vmax.f32 %v547_v29, 0.0  ;;  %1132 = vst.msk [vmem:[%s1616_s29 + $0x78] sm:$0xff] %vm1116_vm2, %v969_v31 }
 0x188   : > { %v1062_v32 = vpop.f32.mrf.mxu3  ;;  %1343 = vmatmul.msk.f32.gmra.mxu1 %vm240_vm1, %v677_v30 }
 0x189   : > { %1163 = vst.msk [vmem:[%s1616_s29 + $0x170] sm:$0xff] %vm1116_vm2, %v1062_v32 }
 0x18a   : > { %v643_v33 = vpop.f32.mrf.mxu2 }
 0x18b   : > { %v709_v34 = vmax.f32 %v643_v33, 0.0 }
 0x18d   : > { %1375 = vmatmul.msk.f32.gmra.mxu3 %vm240_vm1, %v709_v34  ;;  %v972_v35 = vpop.f32.mrf.mxu1 }
 0x18e   : > { %1133 = vst.msk [vmem:[%s1616_s29 + $0x80] sm:$0xff] %vm1116_vm2, %v972_v35 }
 0x190   : > { %v1065_v36 = vpop.f32.mrf.mxu3 }
 0x191   : > { %1164 = vst.msk [vmem:[%s1616_s29 + $0x178] sm:$0xff] %vm1116_vm2, %v1065_v36 }
 0x195   : > { %v975_v37 = vpop.f32.mrf.mxu1 }
 0x196   : > { %1134 = vst.msk [vmem:[%s1616_s29 + $0x88] sm:$0xff] %vm1116_vm2, %v975_v37 }
 0x198   : > { %v1068_v38 = vpop.f32.mrf.mxu3 }
 0x199   : > { %1165 = vst.msk [vmem:[%s1616_s29 + $0x180] sm:$0xff] %vm1116_vm2, %v1068_v38 }
 0x19d   : > { %v978_v39 = vpop.f32.mrf.mxu1 }
 0x19e   : > { %1135 = vst.msk [vmem:[%s1616_s29 + $0x90] sm:$0xff] %vm1116_vm2, %v978_v39 }
 0x1a0   : > { %v1071_v40 = vpop.f32.mrf.mxu3 }
 0x1a1   : > { %1166 = vst.msk [vmem:[%s1616_s29 + $0x188] sm:$0xff] %vm1116_vm2, %v1071_v40 }
 0x1a5   : > { %v981_v41 = vpop.f32.mrf.mxu1 }
 0x1a6   : > { %1136 = vst.msk [vmem:[%s1616_s29 + $0x98] sm:$0xff] %vm1116_vm2, %v981_v41 }
 0x1a8   : > { %v1074_v42 = vpop.f32.mrf.mxu3 }
 0x1a9   : > { %1167 = vst.msk [vmem:[%s1616_s29 + $0x190] sm:$0xff] %vm1116_vm2, %v1074_v42 }
 0x1ad   : > { %v984_v43 = vpop.f32.mrf.mxu1 }
 0x1ae   : > { %1137 = vst.msk [vmem:[%s1616_s29 + $0xa0] sm:$0xff] %vm1116_vm2, %v984_v43 }
 0x1b0   : > { %v1077_v44 = vpop.f32.mrf.mxu3 }
 0x1b1   : > { %1168 = vst.msk [vmem:[%s1616_s29 + $0x198] sm:$0xff] %vm1116_vm2, %v1077_v44 }
 0x1b5   : > { %v987_v45 = vpop.f32.mrf.mxu1 }
 0x1b6   : > { %1138 = vst.msk [vmem:[%s1616_s29 + $0xa8] sm:$0xff] %vm1116_vm2, %v987_v45 }
 0x1b8   : > { %v1080_v46 = vpop.f32.mrf.mxu3 }
 0x1b9   : > { %1169 = vst.msk [vmem:[%s1616_s29 + $0x1a0] sm:$0xff] %vm1116_vm2, %v1080_v46 }
 0x1bd   : > { %v990_v47 = vpop.f32.mrf.mxu1 }
 0x1be   : > { %1139 = vst.msk [vmem:[%s1616_s29 + $0xb0] sm:$0xff] %vm1116_vm2, %v990_v47 }
 0x1c0   : > { %v1083_v48 = vpop.f32.mrf.mxu3 }
 0x1c1   : > { %1170 = vst.msk [vmem:[%s1616_s29 + $0x1a8] sm:$0xff] %vm1116_vm2, %v1083_v48 }
 0x1c5   : > { %v993_v49 = vpop.f32.mrf.mxu1 }
 0x1c6   : > { %1140 = vst.msk [vmem:[%s1616_s29 + $0xb8] sm:$0xff] %vm1116_vm2, %v993_v49 }
 0x1c8   : > { %v1086_v50 = vpop.f32.mrf.mxu3 }
 0x1c9   : > { %1171 = vst.msk [vmem:[%s1616_s29 + $0x1b0] sm:$0xff] %vm1116_vm2, %v1086_v50 }
 0x1cd   : > { %v996_v51 = vpop.f32.mrf.mxu1 }
 0x1ce   : > { %1141 = vst.msk [vmem:[%s1616_s29 + $0xc0] sm:$0xff] %vm1116_vm2, %v996_v51 }
 0x1d0   : > { %v1089_v52 = vpop.f32.mrf.mxu3 }
 0x1d1   : > { %1172 = vst.msk [vmem:[%s1616_s29 + $0x1b8] sm:$0xff] %vm1116_vm2, %v1089_v52 }
 0x1d5   : > { %v999_v53 = vpop.f32.mrf.mxu1 }
 0x1d6   : > { %1142 = vst.msk [vmem:[%s1616_s29 + $0xc8] sm:$0xff] %vm1116_vm2, %v999_v53 }
 0x1d8   : > { %v1092_v54 = vpop.f32.mrf.mxu3 }
 0x1d9   : > { %1173 = vst.msk [vmem:[%s1616_s29 + $0x1c0] sm:$0xff] %vm1116_vm2, %v1092_v54 }
 0x1dd   : > { %v1002_v55 = vpop.f32.mrf.mxu1 }
 0x1de   : > { %1143 = vst.msk [vmem:[%s1616_s29 + $0xd0] sm:$0xff] %vm1116_vm2, %v1002_v55 }
 0x1e0   : > { %v1095_v56 = vpop.f32.mrf.mxu3 }
 0x1e1   : > { %1174 = vst.msk [vmem:[%s1616_s29 + $0x1c8] sm:$0xff] %vm1116_vm2, %v1095_v56 }
 0x1e5   : > { %v1005_v57 = vpop.f32.mrf.mxu1 }
 0x1e6   : > { %1144 = vst.msk [vmem:[%s1616_s29 + $0xd8] sm:$0xff] %vm1116_vm2, %v1005_v57 }
 0x1e8   : > { %v1098_v58 = vpop.f32.mrf.mxu3 }
 0x1e9   : > { %1175 = vst.msk [vmem:[%s1616_s29 + $0x1d0] sm:$0xff] %vm1116_vm2, %v1098_v58 }
 0x1ed   : > { %v1008_v59 = vpop.f32.mrf.mxu1 }
 0x1ee   : > { %1145 = vst.msk [vmem:[%s1616_s29 + $0xe0] sm:$0xff] %vm1116_vm2, %v1008_v59 }
 0x1f0   : > { %v1101_v60 = vpop.f32.mrf.mxu3 }
 0x1f1   : > { %1176 = vst.msk [vmem:[%s1616_s29 + $0x1d8] sm:$0xff] %vm1116_vm2, %v1101_v60 }
 0x1f5   : > { %v1011_v61 = vpop.f32.mrf.mxu1 }
 0x1f6   : > { %1146 = vst.msk [vmem:[%s1616_s29 + $0xe8] sm:$0xff] %vm1116_vm2, %v1011_v61 }
 0x1f8   : > { %v1104_v62 = vpop.f32.mrf.mxu3 }
 0x1f9   : > { %1177 = vst.msk [vmem:[%s1616_s29 + $0x1e0] sm:$0xff] %vm1116_vm2, %v1104_v62 }
 0x1fd   : > { %v1014_v63 = vpop.f32.mrf.mxu1 }
 0x1fe   : > { %1147 = vst.msk [vmem:[%s1616_s29 + $0xf0] sm:$0xff] %vm1116_vm2, %v1014_v63 }
 0x200   : > { %v1107_v0 = vpop.f32.mrf.mxu3 }
 0x201   : > { %1178 = vst.msk [vmem:[%s1616_s29 + $0x1e8] sm:$0xff] %vm1116_vm2, %v1107_v0 }
 0x205   : > { %v1017_v1 = vpop.f32.mrf.mxu1 }
 0x206   : > { %1148 = vst.msk [vmem:[%s1616_s29 + $0xf8] sm:$0xff] %vm1116_vm2, %v1017_v1 }
 0x208   : > { %v1110_v2 = vpop.f32.mrf.mxu3 }
 0x209   : > { %1179 = vst.msk [vmem:[%s1616_s29 + $0x1f0] sm:$0xff] %vm1116_vm2, %v1110_v2 }
 0x210   : > { %v1113_v3 = vpop.f32.mrf.mxu3 }
 0x211   : > { %1180 = vst.msk [vmem:[%s1616_s29 + $0x1f8] sm:$0xff] %vm1116_vm2, %v1113_v3 }
 0x212 PF: > { %s13_s12 = sadd.s32 1, %s1396_s12  }
 0x213   : > { %p10_p4 = scmp.ge.s32.totalorder %s13_s12, 4  }
 0x215   :  { %12 = sbr.rel (!%p10_p4) target bundleno = 1 (0x1), region = 62 }

</bundles_post_ra>
